<compile_context>
chip_gen: v6e
topology: v6e:2x2x1
jax: 0.10.0
libtpu: 0.0.40
codegen_flags: <defaults>
</compile_context>

<pallas_src>
import functools

import jax
import jax.numpy as jnp
from jax import lax
from jax.experimental import pallas as pl
from jax.experimental.pallas import tpu as pltpu


def _lr_kernel(ids_ref, vals_ref, w_ref, bias_ref, out_ref, *, chunk_b):
    """One grid step: a lane-dense block of `block_b` batch columns.

    ids_ref:  (F, block_b)  int16/int32, VMEM  (batch on the lane axis)
    vals_ref: (F, block_b)  float32, VMEM
    w_ref:    (1, nfeat)    float32, VMEM (resident embedding table, dim=1)
    bias_ref: (1, 1)        float32, SMEM
    out_ref:  (1, block_b)  float32, VMEM (lane-dense output row)
    """
    num_fields, block_b = ids_ref.shape
    nfeat = w_ref.shape[1]
    num_chunks = block_b // chunk_b

    w = w_ref[...]                                   # (1, nfeat), hoisted
    bias = bias_ref[0, 0]
    # (nfeat, 1) column iota, hoisted once.  The broadcasts against the
    # (1, chunk_b) id rows happen inside the compare via replicated layouts;
    # no (batch, nfeat) iota is ever materialised.
    n_ids = lax.broadcasted_iota(jnp.int32, (nfeat, 1), 0)

    # Inner chunk loop: large DMA block, small compute working set.  All
    # slices are static (python loops are unrolled at trace time).
    for c in range(num_chunks):
        col = c * chunk_b
        ids_c = ids_ref[:, col:col + chunk_b].astype(jnp.int32)    # (F, chunk_b)
        vals_c = vals_ref[:, col:col + chunk_b]                     # (F, chunk_b)
        acc = jnp.zeros((1, chunk_b), jnp.float32)
        for f in range(num_fields):
            # 2 VPU ops per (nfeat x chunk_b) element: compare + select->f32.
            hit = (ids_c[f:f + 1, :] == n_ids).astype(jnp.float32)  # (nfeat, chunk_b)
            # nfeat-reduction on the MXU (vex slot), not the VPU/XLU.
            g = jnp.dot(w, hit, preferred_element_type=jnp.float32)  # (1, chunk_b)
            acc = acc + g * vals_c[f:f + 1, :]
        out_ref[:, col:col + chunk_b] = acc + bias


def lr_forward(x_id, x_value, weight, bias, *, block_b=2048, chunk_b=256,
               inputs_transposed=False):
    """LRModel forward.

    x_id / x_value: (B, F) by default, or (F, B) if inputs_transposed=True
    (feature-major upstream layout -> no wrapper transpose / extra HBM pass).
    weight: (nfeat, 1) embedding table; bias: (1,).  Returns y of shape (B,).
    Out-of-range ids contribute 0 (a real embedding lookup would error).
    """
    if inputs_transposed:
        num_fields, batch = x_id.shape
        ids_fb, vals_fb = x_id, x_value
    else:
        batch, num_fields = x_id.shape
        ids_fb, vals_fb = x_id.T, x_value.T           # single fused transpose
    nfeat = weight.shape[0]

    if ids_fb.dtype.itemsize > 4 or not jnp.issubdtype(ids_fb.dtype, jnp.integer):
        ids_fb = ids_fb.astype(jnp.int32)             # int8/int16/int32 kept as-is
    vals_fb = vals_fb.astype(jnp.float32)

    # Only batches below one 128-lane tile get padded (negligible); ragged
    # larger batches rely on Pallas partial blocks instead of a pad pass.
    batch_p = max(batch, 128)
    if batch_p != batch:
        ids_fb = jnp.pad(ids_fb, ((0, 0), (0, batch_p - batch)))
        vals_fb = jnp.pad(vals_fb, ((0, 0), (0, batch_p - batch)))

    # Tile selection: big DMA blocks, 128-multiple chunks, and >= 2 grid steps
    # when the batch allows it (v7x megacore gets both TensorCores busy).
    chunk_b = max(128, (int(chunk_b) // 128) * 128)
    chunk_b = min(chunk_b, pl.cdiv(batch_p, 128) * 128)
    block_b = max(chunk_b, (int(block_b) // chunk_b) * chunk_b)
    block_b = min(block_b, pl.cdiv(batch_p, chunk_b) * chunk_b)
    if batch_p > chunk_b:
        block_b = min(block_b, pl.cdiv(pl.cdiv(batch_p, 2), chunk_b) * chunk_b)
    grid = (pl.cdiv(batch_p, block_b),)

    w_row = weight.reshape(1, nfeat).astype(jnp.float32)
    bias_s = bias.reshape(1, 1).astype(jnp.float32)

    id_bytes = ids_fb.dtype.itemsize
    cost = pl.CostEstimate(
        flops=int((4 * nfeat + 4) * num_fields * batch_p),
        transcendentals=0,
        bytes_accessed=int(num_fields * batch_p * (id_bytes + 4)
                           + 4 * (nfeat + batch_p)),
    )

    kernel = functools.partial(_lr_kernel, chunk_b=chunk_b)
    out = pl.pallas_call(
        kernel,
        out_shape=jax.ShapeDtypeStruct((1, batch_p), jnp.float32),
        grid=grid,
        in_specs=[
            pl.BlockSpec((num_fields, block_b), lambda i: (0, i)),   # ids
            pl.BlockSpec((num_fields, block_b), lambda i: (0, i)),   # values
            pl.BlockSpec((1, nfeat), lambda i: (0, 0)),              # resident table
            pl.BlockSpec((1, 1), lambda i: (0, 0),
                         memory_space=pltpu.MemorySpace.SMEM),       # bias scalar
        ],
        out_specs=pl.BlockSpec((1, block_b), lambda i: (0, i)),
        compiler_params=pltpu.CompilerParams(
            dimension_semantics=("parallel",)),
        cost_estimate=cost,
    )(ids_fb, vals_fb, w_row, bias_s)

    return out[0, :batch]                                            # (B,)


def _reference(x_id, x_value, weight, bias):
    return (jnp.sum(weight[x_id.astype(jnp.int32), 0]
                    * x_value.astype(jnp.float32), axis=1) + bias[0])


if __name__ == "__main__":
    F, NFEAT = 16, 64
    key = jax.random.PRNGKey(0)
    k_ids, k_vals, k_w, k_ids2, k_vals2 = jax.random.split(key, 5)

    # Deterministic parameter init (xavier-uniform-like for the (nfeat, 1)
    # embedding table, zero bias -- matches the module's shapes).
    limit = (6.0 / (NFEAT + 1)) ** 0.5
    weight = jax.random.uniform(k_w, (NFEAT, 1), minval=-limit, maxval=limit,
                                dtype=jnp.float32)
    bias = jnp.zeros((1,), dtype=jnp.float32)

    # Case 1: tiny batch (single block, sub-tile lane padding path).
    B1 = 8
    x_id1 = jax.random.randint(k_ids, (B1, F), 0, NFEAT, dtype=jnp.int32)
    x_val1 = jax.random.normal(k_vals, (B1, F), dtype=jnp.float32)
    y1 = lr_forward(x_id1, x_val1, weight, bias)
    jax.block_until_ready(y1)
    assert y1.shape == (B1,)
    assert jnp.allclose(y1, _reference(x_id1, x_val1, weight, bias),
                        atol=1e-5, rtol=1e-5)

    # Case 2: multi-block ragged batch (partial last block, >= 2 grid steps)
    # with int16 ids (halved id HBM traffic).
    B2 = 1000
    x_id2 = jax.random.randint(k_ids2, (B2, F), 0, NFEAT,
                               dtype=jnp.int32).astype(jnp.int16)
    x_val2 = jax.random.normal(k_vals2, (B2, F), dtype=jnp.float32)
    ref2 = _reference(x_id2, x_val2, weight, bias)
    y2 = lr_forward(x_id2, x_val2, weight, bias)
    jax.block_until_ready(y2)
    assert y2.shape == (B2,)
    assert jnp.allclose(y2, ref2, atol=1e-5, rtol=1e-5)

    # Case 3: feature-major inputs produced upstream -> zero wrapper-side
    # transpose / extra HBM pass before the kernel.
    y3 = lr_forward(x_id2.T, x_val2.T, weight, bias, inputs_transposed=True)
    jax.block_until_ready(y3)
    assert jnp.allclose(y3, ref2, atol=1e-5, rtol=1e-5)

    print("KERNEL_OK")
</pallas_src>

<mosaic_0001>
module attributes {stable_mosaic.version = 11 : i64} {
  func.func @_lr_kernel(%arg0: i32, %arg1: memref<16x128xi32, #tpu.memory_space<vmem>>, %arg2: memref<16x128xf32, #tpu.memory_space<vmem>>, %arg3: memref<1x64xf32, #tpu.memory_space<vmem>>, %arg4: memref<1x1xf32, #tpu.memory_space<smem>>, %arg5: memref<1x128xf32, #tpu.memory_space<vmem>>) attributes {dimension_semantics = [#tpu.dimension_semantics<parallel>], iteration_bounds = array<i64: 1>, scalar_prefetch = 0 : i64, scratch_operands = 0 : i64, tpu.core_type = #tpu.core_type<tc>, window_params = [{transform_indices = @transform_0, window_bounds = array<i64: 16, 128>}, {transform_indices = @transform_1, window_bounds = array<i64: 16, 128>}, {pipeline_mode = #tpu.pipeline_mode<synchronous>, transform_indices = @transform_2, window_bounds = array<i64: 1, 64>}, {transform_indices = @transform_3, window_bounds = array<i64: 1, 1>}, {transform_indices = @transform_4, window_bounds = array<i64: 1, 128>}]} {
    %c0 = arith.constant 0 : index
    %c0_0 = arith.constant 0 : index
    %0 = vector.load %arg3[%c0, %c0_0] : memref<1x64xf32, #tpu.memory_space<vmem>>, vector<1x64xf32>
    %c0_1 = arith.constant 0 : index
    %c0_2 = arith.constant 0 : index
    %1 = memref.load %arg4[%c0_1, %c0_2] : memref<1x1xf32, #tpu.memory_space<smem>>
    %2 = tpu.iota {dimensions = array<i32: 0>} : vector<64x1xi32>
    %c0_3 = arith.constant 0 : index
    %c0_4 = arith.constant 0 : index
    %3 = vector.load %arg1[%c0_3, %c0_4] : memref<16x128xi32, #tpu.memory_space<vmem>>, vector<16x128xi32>
    %c0_5 = arith.constant 0 : index
    %c0_6 = arith.constant 0 : index
    %4 = vector.load %arg2[%c0_5, %c0_6] : memref<16x128xf32, #tpu.memory_space<vmem>>, vector<16x128xf32>
    %cst = arith.constant 0.000000e+00 : f32
    %5 = vector.broadcast %cst : f32 to vector<1x128xf32>
    %6 = vector.extract_strided_slice %3 {offsets = [0, 0], sizes = [1, 128], strides = [1, 1]} : vector<16x128xi32> to vector<1x128xi32>
    %7 = vector.broadcast %6 : vector<1x128xi32> to vector<64x128xi32>
    %8 = vector.broadcast %2 : vector<64x1xi32> to vector<64x128xi32>
    %9 = arith.cmpi eq, %7, %8 : vector<64x128xi32>
    %10 = arith.extui %9 : vector<64x128xi1> to vector<64x128xi32>
    %11 = arith.sitofp %10 : vector<64x128xi32> to vector<64x128xf32>
    %cst_7 = arith.constant dense<0.000000e+00> : vector<1x128xf32>
    %12 = tpu.matmul %0, %11, %cst_7 {dimension_numbers = #tpu.dot_dimension_numbers<[1], [0], [0], [1], [0, 0, 1, 1], [], []>} : vector<1x64xf32>, vector<64x128xf32>, vector<1x128xf32> -> vector<1x128xf32>
    %13 = vector.extract_strided_slice %4 {offsets = [0, 0], sizes = [1, 128], strides = [1, 1]} : vector<16x128xf32> to vector<1x128xf32>
    %14 = arith.mulf %12, %13 : vector<1x128xf32>
    %15 = arith.addf %5, %14 : vector<1x128xf32>
    %16 = vector.extract_strided_slice %3 {offsets = [1, 0], sizes = [1, 128], strides = [1, 1]} : vector<16x128xi32> to vector<1x128xi32>
    %17 = vector.broadcast %16 : vector<1x128xi32> to vector<64x128xi32>
    %18 = vector.broadcast %2 : vector<64x1xi32> to vector<64x128xi32>
    %19 = arith.cmpi eq, %17, %18 : vector<64x128xi32>
    %20 = arith.extui %19 : vector<64x128xi1> to vector<64x128xi32>
    %21 = arith.sitofp %20 : vector<64x128xi32> to vector<64x128xf32>
    %cst_8 = arith.constant dense<0.000000e+00> : vector<1x128xf32>
    %22 = tpu.matmul %0, %21, %cst_8 {dimension_numbers = #tpu.dot_dimension_numbers<[1], [0], [0], [1], [0, 0, 1, 1], [], []>} : vector<1x64xf32>, vector<64x128xf32>, vector<1x128xf32> -> vector<1x128xf32>
    %23 = vector.extract_strided_slice %4 {offsets = [1, 0], sizes = [1, 128], strides = [1, 1]} : vector<16x128xf32> to vector<1x128xf32>
    %24 = arith.mulf %22, %23 : vector<1x128xf32>
    %25 = arith.addf %15, %24 : vector<1x128xf32>
    %26 = vector.extract_strided_slice %3 {offsets = [2, 0], sizes = [1, 128], strides = [1, 1]} : vector<16x128xi32> to vector<1x128xi32>
    %27 = vector.broadcast %26 : vector<1x128xi32> to vector<64x128xi32>
    %28 = vector.broadcast %2 : vector<64x1xi32> to vector<64x128xi32>
    %29 = arith.cmpi eq, %27, %28 : vector<64x128xi32>
    %30 = arith.extui %29 : vector<64x128xi1> to vector<64x128xi32>
    %31 = arith.sitofp %30 : vector<64x128xi32> to vector<64x128xf32>
    %cst_9 = arith.constant dense<0.000000e+00> : vector<1x128xf32>
    %32 = tpu.matmul %0, %31, %cst_9 {dimension_numbers = #tpu.dot_dimension_numbers<[1], [0], [0], [1], [0, 0, 1, 1], [], []>} : vector<1x64xf32>, vector<64x128xf32>, vector<1x128xf32> -> vector<1x128xf32>
    %33 = vector.extract_strided_slice %4 {offsets = [2, 0], sizes = [1, 128], strides = [1, 1]} : vector<16x128xf32> to vector<1x128xf32>
    %34 = arith.mulf %32, %33 : vector<1x128xf32>
    %35 = arith.addf %25, %34 : vector<1x128xf32>
    %36 = vector.extract_strided_slice %3 {offsets = [3, 0], sizes = [1, 128], strides = [1, 1]} : vector<16x128xi32> to vector<1x128xi32>
    %37 = vector.broadcast %36 : vector<1x128xi32> to vector<64x128xi32>
    %38 = vector.broadcast %2 : vector<64x1xi32> to vector<64x128xi32>
    %39 = arith.cmpi eq, %37, %38 : vector<64x128xi32>
    %40 = arith.extui %39 : vector<64x128xi1> to vector<64x128xi32>
    %41 = arith.sitofp %40 : vector<64x128xi32> to vector<64x128xf32>
    %cst_10 = arith.constant dense<0.000000e+00> : vector<1x128xf32>
    %42 = tpu.matmul %0, %41, %cst_10 {dimension_numbers = #tpu.dot_dimension_numbers<[1], [0], [0], [1], [0, 0, 1, 1], [], []>} : vector<1x64xf32>, vector<64x128xf32>, vector<1x128xf32> -> vector<1x128xf32>
    %43 = vector.extract_strided_slice %4 {offsets = [3, 0], sizes = [1, 128], strides = [1, 1]} : vector<16x128xf32> to vector<1x128xf32>
    %44 = arith.mulf %42, %43 : vector<1x128xf32>
    %45 = arith.addf %35, %44 : vector<1x128xf32>
    %46 = vector.extract_strided_slice %3 {offsets = [4, 0], sizes = [1, 128], strides = [1, 1]} : vector<16x128xi32> to vector<1x128xi32>
    %47 = vector.broadcast %46 : vector<1x128xi32> to vector<64x128xi32>
    %48 = vector.broadcast %2 : vector<64x1xi32> to vector<64x128xi32>
    %49 = arith.cmpi eq, %47, %48 : vector<64x128xi32>
    %50 = arith.extui %49 : vector<64x128xi1> to vector<64x128xi32>
    %51 = arith.sitofp %50 : vector<64x128xi32> to vector<64x128xf32>
    %cst_11 = arith.constant dense<0.000000e+00> : vector<1x128xf32>
    %52 = tpu.matmul %0, %51, %cst_11 {dimension_numbers = #tpu.dot_dimension_numbers<[1], [0], [0], [1], [0, 0, 1, 1], [], []>} : vector<1x64xf32>, vector<64x128xf32>, vector<1x128xf32> -> vector<1x128xf32>
    %53 = vector.extract_strided_slice %4 {offsets = [4, 0], sizes = [1, 128], strides = [1, 1]} : vector<16x128xf32> to vector<1x128xf32>
    %54 = arith.mulf %52, %53 : vector<1x128xf32>
    %55 = arith.addf %45, %54 : vector<1x128xf32>
    %56 = vector.extract_strided_slice %3 {offsets = [5, 0], sizes = [1, 128], strides = [1, 1]} : vector<16x128xi32> to vector<1x128xi32>
    %57 = vector.broadcast %56 : vector<1x128xi32> to vector<64x128xi32>
    %58 = vector.broadcast %2 : vector<64x1xi32> to vector<64x128xi32>
    %59 = arith.cmpi eq, %57, %58 : vector<64x128xi32>
    %60 = arith.extui %59 : vector<64x128xi1> to vector<64x128xi32>
    %61 = arith.sitofp %60 : vector<64x128xi32> to vector<64x128xf32>
    %cst_12 = arith.constant dense<0.000000e+00> : vector<1x128xf32>
    %62 = tpu.matmul %0, %61, %cst_12 {dimension_numbers = #tpu.dot_dimension_numbers<[1], [0], [0], [1], [0, 0, 1, 1], [], []>} : vector<1x64xf32>, vector<64x128xf32>, vector<1x128xf32> -> vector<1x128xf32>
    %63 = vector.extract_strided_slice %4 {offsets = [5, 0], sizes = [1, 128], strides = [1, 1]} : vector<16x128xf32> to vector<1x128xf32>
    %64 = arith.mulf %62, %63 : vector<1x128xf32>
    %65 = arith.addf %55, %64 : vector<1x128xf32>
    %66 = vector.extract_strided_slice %3 {offsets = [6, 0], sizes = [1, 128], strides = [1, 1]} : vector<16x128xi32> to vector<1x128xi32>
    %67 = vector.broadcast %66 : vector<1x128xi32> to vector<64x128xi32>
    %68 = vector.broadcast %2 : vector<64x1xi32> to vector<64x128xi32>
    %69 = arith.cmpi eq, %67, %68 : vector<64x128xi32>
    %70 = arith.extui %69 : vector<64x128xi1> to vector<64x128xi32>
    %71 = arith.sitofp %70 : vector<64x128xi32> to vector<64x128xf32>
    %cst_13 = arith.constant dense<0.000000e+00> : vector<1x128xf32>
    %72 = tpu.matmul %0, %71, %cst_13 {dimension_numbers = #tpu.dot_dimension_numbers<[1], [0], [0], [1], [0, 0, 1, 1], [], []>} : vector<1x64xf32>, vector<64x128xf32>, vector<1x128xf32> -> vector<1x128xf32>
    %73 = vector.extract_strided_slice %4 {offsets = [6, 0], sizes = [1, 128], strides = [1, 1]} : vector<16x128xf32> to vector<1x128xf32>
    %74 = arith.mulf %72, %73 : vector<1x128xf32>
    %75 = arith.addf %65, %74 : vector<1x128xf32>
    %76 = vector.extract_strided_slice %3 {offsets = [7, 0], sizes = [1, 128], strides = [1, 1]} : vector<16x128xi32> to vector<1x128xi32>
    %77 = vector.broadcast %76 : vector<1x128xi32> to vector<64x128xi32>
    %78 = vector.broadcast %2 : vector<64x1xi32> to vector<64x128xi32>
    %79 = arith.cmpi eq, %77, %78 : vector<64x128xi32>
    %80 = arith.extui %79 : vector<64x128xi1> to vector<64x128xi32>
    %81 = arith.sitofp %80 : vector<64x128xi32> to vector<64x128xf32>
    %cst_14 = arith.constant dense<0.000000e+00> : vector<1x128xf32>
    %82 = tpu.matmul %0, %81, %cst_14 {dimension_numbers = #tpu.dot_dimension_numbers<[1], [0], [0], [1], [0, 0, 1, 1], [], []>} : vector<1x64xf32>, vector<64x128xf32>, vector<1x128xf32> -> vector<1x128xf32>
    %83 = vector.extract_strided_slice %4 {offsets = [7, 0], sizes = [1, 128], strides = [1, 1]} : vector<16x128xf32> to vector<1x128xf32>
    %84 = arith.mulf %82, %83 : vector<1x128xf32>
    %85 = arith.addf %75, %84 : vector<1x128xf32>
    %86 = vector.extract_strided_slice %3 {offsets = [8, 0], sizes = [1, 128], strides = [1, 1]} : vector<16x128xi32> to vector<1x128xi32>
    %87 = vector.broadcast %86 : vector<1x128xi32> to vector<64x128xi32>
    %88 = vector.broadcast %2 : vector<64x1xi32> to vector<64x128xi32>
    %89 = arith.cmpi eq, %87, %88 : vector<64x128xi32>
    %90 = arith.extui %89 : vector<64x128xi1> to vector<64x128xi32>
    %91 = arith.sitofp %90 : vector<64x128xi32> to vector<64x128xf32>
    %cst_15 = arith.constant dense<0.000000e+00> : vector<1x128xf32>
    %92 = tpu.matmul %0, %91, %cst_15 {dimension_numbers = #tpu.dot_dimension_numbers<[1], [0], [0], [1], [0, 0, 1, 1], [], []>} : vector<1x64xf32>, vector<64x128xf32>, vector<1x128xf32> -> vector<1x128xf32>
    %93 = vector.extract_strided_slice %4 {offsets = [8, 0], sizes = [1, 128], strides = [1, 1]} : vector<16x128xf32> to vector<1x128xf32>
    %94 = arith.mulf %92, %93 : vector<1x128xf32>
    %95 = arith.addf %85, %94 : vector<1x128xf32>
    %96 = vector.extract_strided_slice %3 {offsets = [9, 0], sizes = [1, 128], strides = [1, 1]} : vector<16x128xi32> to vector<1x128xi32>
    %97 = vector.broadcast %96 : vector<1x128xi32> to vector<64x128xi32>
    %98 = vector.broadcast %2 : vector<64x1xi32> to vector<64x128xi32>
    %99 = arith.cmpi eq, %97, %98 : vector<64x128xi32>
    %100 = arith.extui %99 : vector<64x128xi1> to vector<64x128xi32>
    %101 = arith.sitofp %100 : vector<64x128xi32> to vector<64x128xf32>
    %cst_16 = arith.constant dense<0.000000e+00> : vector<1x128xf32>
    %102 = tpu.matmul %0, %101, %cst_16 {dimension_numbers = #tpu.dot_dimension_numbers<[1], [0], [0], [1], [0, 0, 1, 1], [], []>} : vector<1x64xf32>, vector<64x128xf32>, vector<1x128xf32> -> vector<1x128xf32>
    %103 = vector.extract_strided_slice %4 {offsets = [9, 0], sizes = [1, 128], strides = [1, 1]} : vector<16x128xf32> to vector<1x128xf32>
    %104 = arith.mulf %102, %103 : vector<1x128xf32>
    %105 = arith.addf %95, %104 : vector<1x128xf32>
    %106 = vector.extract_strided_slice %3 {offsets = [10, 0], sizes = [1, 128], strides = [1, 1]} : vector<16x128xi32> to vector<1x128xi32>
    %107 = vector.broadcast %106 : vector<1x128xi32> to vector<64x128xi32>
    %108 = vector.broadcast %2 : vector<64x1xi32> to vector<64x128xi32>
    %109 = arith.cmpi eq, %107, %108 : vector<64x128xi32>
    %110 = arith.extui %109 : vector<64x128xi1> to vector<64x128xi32>
    %111 = arith.sitofp %110 : vector<64x128xi32> to vector<64x128xf32>
    %cst_17 = arith.constant dense<0.000000e+00> : vector<1x128xf32>
    %112 = tpu.matmul %0, %111, %cst_17 {dimension_numbers = #tpu.dot_dimension_numbers<[1], [0], [0], [1], [0, 0, 1, 1], [], []>} : vector<1x64xf32>, vector<64x128xf32>, vector<1x128xf32> -> vector<1x128xf32>
    %113 = vector.extract_strided_slice %4 {offsets = [10, 0], sizes = [1, 128], strides = [1, 1]} : vector<16x128xf32> to vector<1x128xf32>
    %114 = arith.mulf %112, %113 : vector<1x128xf32>
    %115 = arith.addf %105, %114 : vector<1x128xf32>
    %116 = vector.extract_strided_slice %3 {offsets = [11, 0], sizes = [1, 128], strides = [1, 1]} : vector<16x128xi32> to vector<1x128xi32>
    %117 = vector.broadcast %116 : vector<1x128xi32> to vector<64x128xi32>
    %118 = vector.broadcast %2 : vector<64x1xi32> to vector<64x128xi32>
    %119 = arith.cmpi eq, %117, %118 : vector<64x128xi32>
    %120 = arith.extui %119 : vector<64x128xi1> to vector<64x128xi32>
    %121 = arith.sitofp %120 : vector<64x128xi32> to vector<64x128xf32>
    %cst_18 = arith.constant dense<0.000000e+00> : vector<1x128xf32>
    %122 = tpu.matmul %0, %121, %cst_18 {dimension_numbers = #tpu.dot_dimension_numbers<[1], [0], [0], [1], [0, 0, 1, 1], [], []>} : vector<1x64xf32>, vector<64x128xf32>, vector<1x128xf32> -> vector<1x128xf32>
    %123 = vector.extract_strided_slice %4 {offsets = [11, 0], sizes = [1, 128], strides = [1, 1]} : vector<16x128xf32> to vector<1x128xf32>
    %124 = arith.mulf %122, %123 : vector<1x128xf32>
    %125 = arith.addf %115, %124 : vector<1x128xf32>
    %126 = vector.extract_strided_slice %3 {offsets = [12, 0], sizes = [1, 128], strides = [1, 1]} : vector<16x128xi32> to vector<1x128xi32>
    %127 = vector.broadcast %126 : vector<1x128xi32> to vector<64x128xi32>
    %128 = vector.broadcast %2 : vector<64x1xi32> to vector<64x128xi32>
    %129 = arith.cmpi eq, %127, %128 : vector<64x128xi32>
    %130 = arith.extui %129 : vector<64x128xi1> to vector<64x128xi32>
    %131 = arith.sitofp %130 : vector<64x128xi32> to vector<64x128xf32>
    %cst_19 = arith.constant dense<0.000000e+00> : vector<1x128xf32>
    %132 = tpu.matmul %0, %131, %cst_19 {dimension_numbers = #tpu.dot_dimension_numbers<[1], [0], [0], [1], [0, 0, 1, 1], [], []>} : vector<1x64xf32>, vector<64x128xf32>, vector<1x128xf32> -> vector<1x128xf32>
    %133 = vector.extract_strided_slice %4 {offsets = [12, 0], sizes = [1, 128], strides = [1, 1]} : vector<16x128xf32> to vector<1x128xf32>
    %134 = arith.mulf %132, %133 : vector<1x128xf32>
    %135 = arith.addf %125, %134 : vector<1x128xf32>
    %136 = vector.extract_strided_slice %3 {offsets = [13, 0], sizes = [1, 128], strides = [1, 1]} : vector<16x128xi32> to vector<1x128xi32>
    %137 = vector.broadcast %136 : vector<1x128xi32> to vector<64x128xi32>
    %138 = vector.broadcast %2 : vector<64x1xi32> to vector<64x128xi32>
    %139 = arith.cmpi eq, %137, %138 : vector<64x128xi32>
    %140 = arith.extui %139 : vector<64x128xi1> to vector<64x128xi32>
    %141 = arith.sitofp %140 : vector<64x128xi32> to vector<64x128xf32>
    %cst_20 = arith.constant dense<0.000000e+00> : vector<1x128xf32>
    %142 = tpu.matmul %0, %141, %cst_20 {dimension_numbers = #tpu.dot_dimension_numbers<[1], [0], [0], [1], [0, 0, 1, 1], [], []>} : vector<1x64xf32>, vector<64x128xf32>, vector<1x128xf32> -> vector<1x128xf32>
    %143 = vector.extract_strided_slice %4 {offsets = [13, 0], sizes = [1, 128], strides = [1, 1]} : vector<16x128xf32> to vector<1x128xf32>
    %144 = arith.mulf %142, %143 : vector<1x128xf32>
    %145 = arith.addf %135, %144 : vector<1x128xf32>
    %146 = vector.extract_strided_slice %3 {offsets = [14, 0], sizes = [1, 128], strides = [1, 1]} : vector<16x128xi32> to vector<1x128xi32>
    %147 = vector.broadcast %146 : vector<1x128xi32> to vector<64x128xi32>
    %148 = vector.broadcast %2 : vector<64x1xi32> to vector<64x128xi32>
    %149 = arith.cmpi eq, %147, %148 : vector<64x128xi32>
    %150 = arith.extui %149 : vector<64x128xi1> to vector<64x128xi32>
    %151 = arith.sitofp %150 : vector<64x128xi32> to vector<64x128xf32>
    %cst_21 = arith.constant dense<0.000000e+00> : vector<1x128xf32>
    %152 = tpu.matmul %0, %151, %cst_21 {dimension_numbers = #tpu.dot_dimension_numbers<[1], [0], [0], [1], [0, 0, 1, 1], [], []>} : vector<1x64xf32>, vector<64x128xf32>, vector<1x128xf32> -> vector<1x128xf32>
    %153 = vector.extract_strided_slice %4 {offsets = [14, 0], sizes = [1, 128], strides = [1, 1]} : vector<16x128xf32> to vector<1x128xf32>
    %154 = arith.mulf %152, %153 : vector<1x128xf32>
    %155 = arith.addf %145, %154 : vector<1x128xf32>
    %156 = vector.extract_strided_slice %3 {offsets = [15, 0], sizes = [1, 128], strides = [1, 1]} : vector<16x128xi32> to vector<1x128xi32>
    %157 = vector.broadcast %156 : vector<1x128xi32> to vector<64x128xi32>
    %158 = vector.broadcast %2 : vector<64x1xi32> to vector<64x128xi32>
    %159 = arith.cmpi eq, %157, %158 : vector<64x128xi32>
    %160 = arith.extui %159 : vector<64x128xi1> to vector<64x128xi32>
    %161 = arith.sitofp %160 : vector<64x128xi32> to vector<64x128xf32>
    %cst_22 = arith.constant dense<0.000000e+00> : vector<1x128xf32>
    %162 = tpu.matmul %0, %161, %cst_22 {dimension_numbers = #tpu.dot_dimension_numbers<[1], [0], [0], [1], [0, 0, 1, 1], [], []>} : vector<1x64xf32>, vector<64x128xf32>, vector<1x128xf32> -> vector<1x128xf32>
    %163 = vector.extract_strided_slice %4 {offsets = [15, 0], sizes = [1, 128], strides = [1, 1]} : vector<16x128xf32> to vector<1x128xf32>
    %164 = arith.mulf %162, %163 : vector<1x128xf32>
    %165 = arith.addf %155, %164 : vector<1x128xf32>
    %166 = vector.broadcast %1 : f32 to vector<1x128xf32>
    %167 = arith.addf %165, %166 : vector<1x128xf32>
    %c0_23 = arith.constant 0 : index
    %c0_24 = arith.constant 0 : index
    %168 = vector.load %arg5[%c0_23, %c0_24] : memref<1x128xf32, #tpu.memory_space<vmem>>, vector<1x128xf32>
    tpu.vector_store %arg5[%c0_23, %c0_24], %167 {strides = array<i32>} : memref<1x128xf32, #tpu.memory_space<vmem>>, vector<1x128xf32>,
    return
  }
  func.func @transform_0(%arg0: i32) -> (i32, i32) {
    %c0_i32 = arith.constant 0 : i32
    %c0_i32_0 = arith.constant 0 : i32
    return %c0_i32, %arg0 : i32, i32
  }
  func.func @transform_1(%arg0: i32) -> (i32, i32) {
    %c0_i32 = arith.constant 0 : i32
    %c0_i32_0 = arith.constant 0 : i32
    return %c0_i32, %arg0 : i32, i32
  }
  func.func @transform_2(%arg0: i32) -> (i32, i32) {
    %c0_i32 = arith.constant 0 : i32
    %c0_i32_0 = arith.constant 0 : i32
    %c0_i32_1 = arith.constant 0 : i32
    return %c0_i32, %c0_i32_0 : i32, i32
  }
  func.func @transform_3(%arg0: i32) -> (i32, i32) {
    %c0_i32 = arith.constant 0 : i32
    %c0_i32_0 = arith.constant 0 : i32
    %c0_i32_1 = arith.constant 0 : i32
    return %c0_i32, %c0_i32_0 : i32, i32
  }
  func.func @transform_4(%arg0: i32) -> (i32, i32) {
    %c0_i32 = arith.constant 0 : i32
    %c0_i32_0 = arith.constant 0 : i32
    return %c0_i32, %arg0 : i32, i32
  }
}

</mosaic_0001>

<bundles_post_ra>
// kernel: tpu_custom_call.1
= control target key start
LH: loop header
LB: loop body
LE: loop exit
PB: predicated region body
PF: predicated region fallthrough
CT: control target
= control target key end

     0   :  { %10 = vsyncpa [#allocation4], 0  ;;  %s3460_s0 = inlined_call_operand.hbm [shape: s32[16,128], index: 0, kind: input, shape index: {}]   ;;  %s3461_s1 = inlined_call_operand.hbm [shape: f32[16,128], index: 1, kind: input, shape index: {}]   ;;  %s3462_s2 = inlined_call_operand.vmem [shape: f32[1,64], index: 2, kind: input, shape index: {}]   ;;  %s3463_s3 = inlined_call_operand.<no memory space> [shape: f32[1,1], index: 3, kind: input, shape index: {}]   ;;  %s3464_s4 = inlined_call_operand.hbm [shape: f32[1,128], index: 4, kind: output, shape index: {}]  }
   0x1   :  { %11 = vsyncpa [#allocation7], 0 }
   0x2   :  { %12 = vsyncpa [#allocation5], 0  ;;  %s2509_s15 = smov [#allocation3]  }
   0x3   :  { %s18_s16 = sshll.u32 %s2509_s15, 4  ;;  %s19_s16 = int_to_ptr.vmem [resolvable:$true] %s18_s16 }
   0x4   :  { %s2451_s17 = scalar_lea.vmem %s19_s16, 256  ;;  %p2456_p1 = scmp.lt.s32.totalorder %s19_s16, %s19_s16 }
   0x5   :  { %p2452_p0 = scmp.ne.s32.totalorder %s19_s16, %s2451_s17  ;;  %p2457_p2 = scmp.lt.s32.totalorder %s2451_s17, %s2451_s17 }
   0x7   :  { %p2458_p3 = por %p2457_p2, %p2456_p1 }
   0x9   :  { %p2459_p4 = pnand %p2458_p3, %p2452_p0 }
   0xb   :  { %2462 = shalt.err (!%p2459_p4)
}
   0xc   :  { %s2510_s18 = smov 128   ;;  %s2511_s19 = smov 8  }
   0xd   :  { %24 = dma.hbm_to_vmem [thread:$0]  %s3460_s0, 256, %s19_s16, [#allocation4], %s2510_s18, %s2510_s18, %s2511_s19  }
   0xe   :  { %s2512_s22 = smov [#allocation6]  }
   0xf   :  { %s30_s23 = sshll.u32 %s2512_s22, 4  ;;  %s31_s23 = int_to_ptr.vmem [resolvable:$true] %s30_s23 }
  0x10   :  { %s2471_s24 = scalar_lea.vmem %s31_s23, 256  ;;  %p2476_p6 = scmp.lt.s32.totalorder %s31_s23, %s31_s23 }
  0x11   :  { %p2472_p5 = scmp.ne.s32.totalorder %s31_s23, %s2471_s24  ;;  %p2477_p7 = scmp.lt.s32.totalorder %s2471_s24, %s2471_s24 }
  0x13   :  { %p2478_p8 = por %p2477_p7, %p2476_p6 }
  0x15   :  { %p2479_p9 = pnand %p2478_p8, %p2472_p5 }
  0x17   :  { %2482 = shalt.err (!%p2479_p9)
}
  0x18   :  { %36 = dma.hbm_to_vmem [thread:$0]  %s3461_s1, 256, %s31_s23, [#allocation7], %s2510_s18, %s2510_s18, %s2511_s19  }
  0x19   :  { %2503 = dma.done.wait [#allocation4], 256  }
  0x1a   :  { %2504 = vsyncadd [#allocation4], 4294967040 }
  0x1b   :  { %2505 = dma.done.wait [#allocation7], 256  }
  0x1c   :  { %2506 = vsyncadd [#allocation7], 4294967040  ;;  %v49_v0 = vlaneseq  ;;  %v2513_v1 = vmov 0.0   ;;  %vm2514_vm0 = vmmov 0   ;;  %v2564_v7 = vld [vmem:[#allocation3] sm:$0xff]  ;;  %v2515_v12 = vmov 1.0  }
  0x1d   :  { %2131 = vmatprep.subr.mxu0 %v2513_v1  ;;  %2150 = vmatprep.subr.mxu1 %v2513_v1  ;;  %v2644_v22 = vld [vmem:[%s3462_s2] sm:$0x1]  ;;  %v2680_v25 = vld [vmem:[#allocation3 + $0x8] sm:$0xff]  ;;  %v60_v38 = vld [vmem:[#allocation6] sm:$0xff]  ;;  %s2516_s28 = smov [#allocation8]  }
  0x1e   :  { %v2550_v2 = vshrl.u32 %v49_v0, 7  ;;  %2147 = vmatprep.mubr.msk.f32.mxu0 %vm2514_vm0, %v2513_v1  ;;  %2166 = vmatprep.mubr.msk.f32.mxu1 %vm2514_vm0, %v2513_v1  ;;  %v265_v39 = vrot.slane %v60_v38, 1  ;;  %v367_v47 = vrot.slane %v60_v38, 2  ;;  %v469_v48 = vrot.slane %v60_v38, 3  ;;  %s1705_s29 = sshll.u32 %s2516_s28, 4  ;;  %s1706_s29 = int_to_ptr.vmem [resolvable:$true] %s1705_s29 }
  0x1f   :  { %v571_v57 = vrot.slane %v60_v38, 4  ;;  %v673_v58 = vrot.slane %v60_v38, 5  ;;  %s2483_s30 = scalar_lea.vmem %s1706_s29, 16  ;;  %s2487_s5 = scalar_lea.vmem %s1706_s29, 32 }
  0x20   :  { %v64_v3 = vsub.s32 0, %v2550_v2  ;;  %v168_v4 = vsub.s32 1, %v2550_v2  ;;  %v2559_v5 = vadd.s32 56, %v2550_v2  ;;  %v2562_v6 = vadd.s32 48, %v2550_v2  ;;  %p2484_p10 = scmp.ne.s32.totalorder %s1706_s29, %s2483_s30  ;;  %p2488_p11 = scmp.lt.s32.totalorder %s1706_s29, %s1706_s29 }
  0x21   :  { %v2573_v10 = vadd.s32 40, %v2550_v2  ;;  %v2576_v11 = vadd.s32 32, %v2550_v2  ;;  %v2589_v13 = vadd.s32 24, %v2550_v2  ;;  %v2598_v14 = vadd.s32 16, %v2550_v2  ;;  %p2489_p12 = scmp.lt.s32.totalorder %s2487_s5, %s2483_s30 }
  0x22   :  { %v65_v8 = vrot.slane %v2564_v7, %v64_v3  ;;  %v169_v9 = vrot.slane %v2564_v7, %v168_v4  ;;  %v2607_v15 = vadd.s32 8, %v2550_v2  ;;  %v271_v16 = vsub.s32 2, %v2550_v2 }
  0x23   :  { %v373_v17 = vsub.s32 3, %v2550_v2  ;;  %v475_v20 = vsub.s32 4, %v2550_v2  ;;  %v577_v21 = vsub.s32 5, %v2550_v2  ;;  %v2705_v26 = vrot.slane %v2680_v25, %v64_v3  ;;  %p2490_p13 = por %p2489_p12, %p2488_p11 }
  0x24   :  { %vm73_vm1 = vcmp.eq.s32.totalorder %v65_v8, %v2559_v5  ;;  %vm177_vm2 = vcmp.eq.s32.totalorder %v169_v9, %v2559_v5  ;;  %vm72_vm3 = vcmp.eq.s32.totalorder %v65_v8, %v2562_v6  ;;  %vm176_vm4 = vcmp.eq.s32.totalorder %v169_v9, %v2562_v6 }
  0x25   :  { %2132 = vmatpush3.msk.msra.mxu0 %vm73_vm1, %v2515_v12  ;;  %2151 = vmatpush3.msk.msra.mxu1 %vm177_vm2, %v2515_v12  ;;  %vm71_vm5 = vcmp.eq.s32.totalorder %v65_v8, %v2573_v10  ;;  %vm175_vm6 = vcmp.eq.s32.totalorder %v169_v9, %v2573_v10  ;;  %vm70_vm7 = vcmp.eq.s32.totalorder %v65_v8, %v2576_v11  ;;  %vm90_vm2 = vcmask 523264   ;;  %p2491_p0 = pnand %p2490_p13, %p2484_p10 }
  0x26   :  { %2133 = vmatprep.subr.mxu0 %v2513_v1  ;;  %2152 = vmatprep.subr.mxu1 %v2513_v1  ;;  %vm174_vm8 = vcmp.eq.s32.totalorder %v169_v9, %v2576_v11  ;;  %vm69_vm9 = vcmp.eq.s32.totalorder %v65_v8, %v2589_v13  ;;  %vm173_vm10 = vcmp.eq.s32.totalorder %v169_v9, %v2589_v13  ;;  %v679_v32 = vsub.s32 6, %v2550_v2 }
  0x27   :  { %2134 = vmatpush3.msk.msra.mxu0 %vm72_vm3, %v2515_v12  ;;  %2153 = vmatpush3.msk.msra.mxu1 %vm176_vm4, %v2515_v12  ;;  %vm68_vm11 = vcmp.eq.s32.totalorder %v65_v8, %v2598_v14  ;;  %vm172_vm12 = vcmp.eq.s32.totalorder %v169_v9, %v2598_v14  ;;  %vm67_vm13 = vcmp.eq.s32.totalorder %v65_v8, %v2607_v15  ;;  %v781_v33 = vsub.s32 7, %v2550_v2 }
  0x28   :  { %2135 = vmatprep.subr.mxu0 %v2513_v1  ;;  %2154 = vmatprep.subr.mxu1 %v2513_v1  ;;  %vm171_vm14 = vcmp.eq.s32.totalorder %v169_v9, %v2607_v15  ;;  %v2626_v18 = vrot.slane %v2564_v7, %v271_v16  ;;  %v2631_v19 = vrot.slane %v2564_v7, %v373_v17 }
  0x29   :  { %2136 = vmatpush3.msk.msra.mxu0 %vm71_vm5, %v2515_v12  ;;  %2155 = vmatpush3.msk.msra.mxu1 %vm175_vm6, %v2515_v12  ;;  %vm66_vm15 = vcmp.eq.s32.totalorder %v65_v8, %v2550_v2  ;;  %vm170_vm1 = vcmp.eq.s32.totalorder %v169_v9, %v2550_v2  ;;  %v2658_v23 = vrot.slane %v2564_v7, %v475_v20 }
  0x2a   :  { %2137 = vmatprep.subr.mxu0 %v2513_v1  ;;  %2156 = vmatprep.subr.mxu1 %v2513_v1  ;;  %vm280_vm3 = vcmp.eq.s32.totalorder %v2626_v18, %v2559_v5  ;;  %vm382_vm4 = vcmp.eq.s32.totalorder %v2631_v19, %v2559_v5  ;;  %v2661_v24 = vrot.slane %v2564_v7, %v577_v21 }
  0x2b   :  { %2138 = vmatpush3.msk.msra.mxu0 %vm70_vm7, %v2515_v12  ;;  %2157 = vmatpush3.msk.msra.mxu1 %vm174_vm8, %v2515_v12  ;;  %vm279_vm5 = vcmp.eq.s32.totalorder %v2626_v18, %v2562_v6  ;;  %vm381_vm6 = vcmp.eq.s32.totalorder %v2631_v19, %v2562_v6  ;;  %vm278_vm7 = vcmp.eq.s32.totalorder %v2626_v18, %v2573_v10 }
  0x2c   :  { %2139 = vmatprep.subr.mxu0 %v2513_v1  ;;  %2158 = vmatprep.subr.mxu1 %v2513_v1  ;;  %vm380_vm8 = vcmp.eq.s32.totalorder %v2631_v19, %v2573_v10  ;;  %v2710_v27 = vrot.slane %v2680_v25, %v168_v4  ;;  %v2713_v28 = vrot.slane %v2680_v25, %v271_v16 }
  0x2d   :  { %2140 = vmatpush3.msk.msra.mxu0 %vm69_vm9, %v2515_v12  ;;  %2159 = vmatpush3.msk.msra.mxu1 %vm173_vm10, %v2515_v12  ;;  %vm277_vm9 = vcmp.eq.s32.totalorder %v2626_v18, %v2576_v11  ;;  %vm379_vm10 = vcmp.eq.s32.totalorder %v2631_v19, %v2576_v11  ;;  %v2728_v29 = vrot.slane %v2680_v25, %v373_v17  ;;  %v877_v17 = vrot.slane %v60_v38, 7 }
  0x2e   :  { %2141 = vmatprep.subr.mxu0 %v2513_v1  ;;  %2160 = vmatprep.subr.mxu1 %v2513_v1  ;;  %v2731_v30 = vrot.slane %v2680_v25, %v475_v20  ;;  %v2734_v31 = vrot.slane %v2680_v25, %v577_v21  ;;  %v2937_v34 = vrot.slane %v2680_v25, %v679_v32 }
  0x2f   :  { %2142 = vmatpush3.msk.msra.mxu0 %vm68_vm11, %v2515_v12  ;;  %2161 = vmatpush3.msk.msra.mxu1 %vm172_vm12, %v2515_v12  ;;  %vm276_vm11 = vcmp.eq.s32.totalorder %v2626_v18, %v2589_v13  ;;  %vm378_vm12 = vcmp.eq.s32.totalorder %v2631_v19, %v2589_v13  ;;  %v2940_v35 = vrot.slane %v2680_v25, %v781_v33 }
  0x30   :  { %2143 = vmatprep.subr.mxu0 %v2513_v1  ;;  %2162 = vmatprep.subr.mxu1 %v2513_v1  ;;  %v680_v36 = vrot.slane %v2564_v7, %v679_v32  ;;  %v782_v37 = vrot.slane %v2564_v7, %v781_v33 }
  0x31   :  { %2144 = vmatpush3.msk.msra.mxu0 %vm67_vm13, %v2515_v12  ;;  %2163 = vmatpush3.msk.msra.mxu1 %vm171_vm14, %v2515_v12  ;;  %vm275_vm13 = vcmp.eq.s32.totalorder %v2626_v18, %v2598_v14  ;;  %vm377_vm14 = vcmp.eq.s32.totalorder %v2631_v19, %v2598_v14 }
  0x32   :  { %2145 = vmatprep.subr.mxu0 %v2513_v1  ;;  %2164 = vmatprep.subr.mxu1 %v2513_v1 }
  0x33   :  { %2146 = vmatpush3.msk.msra.mxu0 %vm66_vm15, %v2515_v12  ;;  %2165 = vmatpush3.msk.msra.mxu1 %vm170_vm1, %v2515_v12  ;;  %vm274_vm15 = vcmp.eq.s32.totalorder %v2626_v18, %v2607_v15  ;;  %vm376_vm1 = vcmp.eq.s32.totalorder %v2631_v19, %v2607_v15 }
  0x34   :  { %2148 = vmatmul.mubr.msk.f32.vlgmr.msra.gmra.mxu0 %vm90_vm2, %v2644_v22  ;;  %2169 = vmatprep.subr.mxu0 %v2513_v1 }
  0x35   :  { %2188 = vmatprep.subr.mxu1 %v2513_v1  ;;  %2167 = vmatmul.mubr.msk.f32.vlgmr.msra.gmra.mxu1 %vm90_vm2, %v2644_v22 }
  0x36   :  { %2170 = vmatpush3.msk.msra.mxu0 %vm280_vm3, %v2515_v12  ;;  %2189 = vmatpush3.msk.msra.mxu1 %vm382_vm4, %v2515_v12  ;;  %vm273_vm3 = vcmp.eq.s32.totalorder %v2626_v18, %v2550_v2  ;;  %vm375_vm4 = vcmp.eq.s32.totalorder %v2631_v19, %v2550_v2  ;;  %v61_v18 = vld [vmem:[#allocation6 + $0x8] sm:$0xff] }
  0x37   :  { %2171 = vmatprep.subr.mxu0 %v2513_v1  ;;  %2190 = vmatprep.subr.mxu1 %v2513_v1  ;;  %v1182_v25 = vrot.slane %v61_v18, 2  ;;  %v1284_v32 = vrot.slane %v61_v18, 3 }
  0x38   :  { %2172 = vmatpush3.msk.msra.mxu0 %vm279_vm5, %v2515_v12  ;;  %2191 = vmatpush3.msk.msra.mxu1 %vm381_vm6, %v2515_v12  ;;  %vm585_vm5 = vcmp.eq.s32.totalorder %v2661_v24, %v2562_v6  ;;  %vm1295_vm6 = vcmp.eq.s32.totalorder %v2731_v30, %v2589_v13 }
  0x39   :  { %2173 = vmatprep.subr.mxu0 %v2513_v1  ;;  %2192 = vmatprep.subr.mxu1 %v2513_v1 }
  0x3a   :  { %2174 = vmatpush3.msk.msra.mxu0 %vm278_vm7, %v2515_v12  ;;  %2193 = vmatpush3.msk.msra.mxu1 %vm380_vm8, %v2515_v12  ;;  %vm586_vm7 = vcmp.eq.s32.totalorder %v2661_v24, %v2559_v5  ;;  %vm1298_vm8 = vcmp.eq.s32.totalorder %v2731_v30, %v2562_v6 }
  0x3b   :  { %2175 = vmatprep.subr.mxu0 %v2513_v1  ;;  %2194 = vmatprep.subr.mxu1 %v2513_v1 }
  0x3c   :  { %2176 = vmatpush3.msk.msra.mxu0 %vm277_vm9, %v2515_v12  ;;  %2195 = vmatpush3.msk.msra.mxu1 %vm379_vm10, %v2515_v12  ;;  %vm484_vm9 = vcmp.eq.s32.totalorder %v2658_v23, %v2559_v5  ;;  %vm584_vm10 = vcmp.eq.s32.totalorder %v2661_v24, %v2573_v10 }
  0x3d   :  { %2177 = vmatprep.subr.mxu0 %v2513_v1  ;;  %2196 = vmatprep.subr.mxu1 %v2513_v1 }
  0x3e   :  { %2178 = vmatpush3.msk.msra.mxu0 %vm276_vm11, %v2515_v12  ;;  %2197 = vmatpush3.msk.msra.mxu1 %vm378_vm12, %v2515_v12  ;;  %vm483_vm11 = vcmp.eq.s32.totalorder %v2658_v23, %v2562_v6  ;;  %vm583_vm12 = vcmp.eq.s32.totalorder %v2661_v24, %v2576_v11 }
  0x3f   :  { %2179 = vmatprep.subr.mxu0 %v2513_v1  ;;  %2198 = vmatprep.subr.mxu1 %v2513_v1 }
  0x40   :  { %2180 = vmatpush3.msk.msra.mxu0 %vm275_vm13, %v2515_v12  ;;  %2199 = vmatpush3.msk.msra.mxu1 %vm377_vm14, %v2515_v12  ;;  %vm482_vm13 = vcmp.eq.s32.totalorder %v2658_v23, %v2573_v10  ;;  %vm1604_vm14 = vcmp.eq.s32.totalorder %v2940_v35, %v2562_v6 }
  0x41   :  { %2181 = vmatprep.subr.mxu0 %v2513_v1  ;;  %2200 = vmatprep.subr.mxu1 %v2513_v1 }
  0x42   :  { %2182 = vmatpush3.msk.msra.mxu0 %vm274_vm15, %v2515_v12  ;;  %2201 = vmatpush3.msk.msra.mxu1 %vm376_vm1, %v2515_v12  ;;  %vm481_vm15 = vcmp.eq.s32.totalorder %v2658_v23, %v2576_v11  ;;  %vm1400_vm1 = vcmp.eq.s32.totalorder %v2734_v31, %v2562_v6 }
  0x43   :  { %2183 = vmatprep.subr.mxu0 %v2513_v1  ;;  %2202 = vmatprep.subr.mxu1 %v2513_v1 }
  0x44   :  { %2184 = vmatpush3.msk.msra.mxu0 %vm273_vm3, %v2515_v12  ;;  %2185 = vmatprep.mubr.msk.f32.mxu0 %vm2514_vm0, %v2513_v1  ;;  %vm480_vm3 = vcmp.eq.s32.totalorder %v2658_v23, %v2589_v13 }
  0x45   :  { %2203 = vmatpush3.msk.msra.mxu1 %vm375_vm4, %v2515_v12  ;;  %2186 = vmatmul.mubr.msk.f32.vlgmr.msra.gmra.mxu0 %vm90_vm2, %v2644_v22  ;;  %vm3465_vm4 = vcmp.eq.s32.totalorder %v2661_v24, %v2589_v13 }
  0x46   :  { %2204 = vmatprep.mubr.msk.f32.mxu1 %vm2514_vm0, %v2513_v1  ;;  %2207 = vmatprep.subr.mxu0 %v2513_v1 }
  0x47   :  { %2226 = vmatprep.subr.mxu1 %v2513_v1  ;;  %2205 = vmatmul.mubr.msk.f32.vlgmr.msra.gmra.mxu1 %vm90_vm2, %v2644_v22 }
  0x48   :  { %2208 = vmatpush3.msk.msra.mxu0 %vm484_vm9, %v2515_v12  ;;  %2227 = vmatpush3.msk.msra.mxu1 %vm586_vm7, %v2515_v12  ;;  %vm478_vm9 = vcmp.eq.s32.totalorder %v2658_v23, %v2607_v15  ;;  %vm580_vm7 = vcmp.eq.s32.totalorder %v2661_v24, %v2607_v15 }
  0x49   :  { %2209 = vmatprep.subr.mxu0 %v2513_v1  ;;  %2228 = vmatprep.subr.mxu1 %v2513_v1 }
  0x4a   :  { %2210 = vmatpush3.msk.msra.mxu0 %vm483_vm11, %v2515_v12  ;;  %2229 = vmatpush3.msk.msra.mxu1 %vm585_vm5, %v2515_v12  ;;  %vm479_vm11 = vcmp.eq.s32.totalorder %v2658_v23, %v2598_v14  ;;  %vm581_vm5 = vcmp.eq.s32.totalorder %v2661_v24, %v2598_v14 }
  0x4b   :  { %2211 = vmatprep.subr.mxu0 %v2513_v1  ;;  %2230 = vmatprep.subr.mxu1 %v2513_v1 }
  0x4c   :  { %2212 = vmatpush3.msk.msra.mxu0 %vm482_vm13, %v2515_v12  ;;  %2231 = vmatpush3.msk.msra.mxu1 %vm584_vm10, %v2515_v12  ;;  %vm1601_vm13 = vcmp.eq.s32.totalorder %v2940_v35, %v2589_v13  ;;  %vm788_vm10 = vcmp.eq.s32.totalorder %v782_v37, %v2573_v10 }
  0x4d   :  { %2213 = vmatprep.subr.mxu0 %v2513_v1  ;;  %2232 = vmatprep.subr.mxu1 %v2513_v1 }
  0x4e   :  { %2214 = vmatpush3.msk.msra.mxu0 %vm481_vm15, %v2515_v12  ;;  %2233 = vmatpush3.msk.msra.mxu1 %vm583_vm12, %v2515_v12  ;;  %vm1498_vm15 = vcmp.eq.s32.totalorder %v2937_v34, %v2598_v14  ;;  %vm1599_vm12 = vcmp.eq.s32.totalorder %v2940_v35, %v2607_v15 }
  0x4f   :  { %2215 = vmatprep.subr.mxu0 %v2513_v1  ;;  %2234 = vmatprep.subr.mxu1 %v2513_v1 }
  0x50   :  { %2216 = vmatpush3.msk.msra.mxu0 %vm480_vm3, %v2515_v12  ;;  %2235 = vmatpush3.msk.msra.mxu1 %vm3465_vm4, %v2515_v12  ;;  %vm1497_vm3 = vcmp.eq.s32.totalorder %v2937_v34, %v2607_v15  ;;  %vm477_vm4 = vcmp.eq.s32.totalorder %v2658_v23, %v2550_v2 }
  0x51   :  { %2217 = vmatprep.subr.mxu0 %v2513_v1  ;;  %2236 = vmatprep.subr.mxu1 %v2513_v1 }
  0x52   :  { %2218 = vmatpush3.msk.msra.mxu0 %vm479_vm11, %v2515_v12  ;;  %2237 = vmatpush3.msk.msra.mxu1 %vm581_vm5, %v2515_v12  ;;  %vm579_vm11 = vcmp.eq.s32.totalorder %v2661_v24, %v2550_v2  ;;  %vm687_vm5 = vcmp.eq.s32.totalorder %v680_v36, %v2562_v6 }
  0x53   :  { %2219 = vmatprep.subr.mxu0 %v2513_v1  ;;  %2238 = vmatprep.subr.mxu1 %v2513_v1 }
  0x54   :  { %2220 = vmatpush3.msk.msra.mxu0 %vm478_vm9, %v2515_v12  ;;  %2239 = vmatpush3.msk.msra.mxu1 %vm580_vm7, %v2515_v12  ;;  %vm688_vm9 = vcmp.eq.s32.totalorder %v680_v36, %v2559_v5  ;;  %vm790_vm7 = vcmp.eq.s32.totalorder %v782_v37, %v2559_v5 }
  0x55   :  { %2221 = vmatprep.subr.mxu0 %v2513_v1  ;;  %2240 = vmatprep.subr.mxu1 %v2513_v1 }
  0x56   :  { %2222 = vmatpush3.msk.msra.mxu0 %vm477_vm4, %v2515_v12  ;;  %2223 = vmatprep.mubr.msk.f32.mxu0 %vm2514_vm0, %v2513_v1  ;;  %vm789_vm4 = vcmp.eq.s32.totalorder %v782_v37, %v2562_v6 }
  0x57   :  { %2241 = vmatpush3.msk.msra.mxu1 %vm579_vm11, %v2515_v12  ;;  %2224 = vmatmul.mubr.msk.f32.vlgmr.msra.gmra.mxu0 %vm90_vm2, %v2644_v22  ;;  %vm686_vm11 = vcmp.eq.s32.totalorder %v680_v36, %v2573_v10 }
  0x58   :  { %2242 = vmatprep.mubr.msk.f32.mxu1 %vm2514_vm0, %v2513_v1  ;;  %2245 = vmatprep.subr.mxu0 %v2513_v1 }
  0x59   :  { %2264 = vmatprep.subr.mxu1 %v2513_v1  ;;  %2243 = vmatmul.mubr.msk.f32.vlgmr.msra.gmra.mxu1 %vm90_vm2, %v2644_v22 }
  0x5a   :  { %2246 = vmatpush3.msk.msra.mxu0 %vm688_vm9, %v2515_v12  ;;  %2265 = vmatpush3.msk.msra.mxu1 %vm790_vm7, %v2515_v12  ;;  %vm685_vm9 = vcmp.eq.s32.totalorder %v680_v36, %v2576_v11  ;;  %vm787_vm7 = vcmp.eq.s32.totalorder %v782_v37, %v2576_v11 }
  0x5b   :  { %2247 = vmatprep.subr.mxu0 %v2513_v1  ;;  %2266 = vmatprep.subr.mxu1 %v2513_v1 }
  0x5c   :  { %2248 = vmatpush3.msk.msra.mxu0 %vm687_vm5, %v2515_v12  ;;  %2267 = vmatpush3.msk.msra.mxu1 %vm789_vm4, %v2515_v12  ;;  %vm684_vm5 = vcmp.eq.s32.totalorder %v680_v36, %v2589_v13  ;;  %vm786_vm4 = vcmp.eq.s32.totalorder %v782_v37, %v2589_v13 }
  0x5d   :  { %2249 = vmatprep.subr.mxu0 %v2513_v1  ;;  %2268 = vmatprep.subr.mxu1 %v2513_v1 }
  0x5e   :  { %2250 = vmatpush3.msk.msra.mxu0 %vm686_vm11, %v2515_v12  ;;  %2269 = vmatpush3.msk.msra.mxu1 %vm788_vm10, %v2515_v12  ;;  %vm683_vm11 = vcmp.eq.s32.totalorder %v680_v36, %v2598_v14  ;;  %vm785_vm10 = vcmp.eq.s32.totalorder %v782_v37, %v2598_v14 }
  0x5f   :  { %2251 = vmatprep.subr.mxu0 %v2513_v1  ;;  %2270 = vmatprep.subr.mxu1 %v2513_v1 }
  0x60   :  { %2252 = vmatpush3.msk.msra.mxu0 %vm685_vm9, %v2515_v12  ;;  %2271 = vmatpush3.msk.msra.mxu1 %vm787_vm7, %v2515_v12  ;;  %vm682_vm9 = vcmp.eq.s32.totalorder %v680_v36, %v2607_v15  ;;  %vm784_vm7 = vcmp.eq.s32.totalorder %v782_v37, %v2607_v15 }
  0x61   :  { %2253 = vmatprep.subr.mxu0 %v2513_v1  ;;  %2272 = vmatprep.subr.mxu1 %v2513_v1 }
  0x62   :  { %2254 = vmatpush3.msk.msra.mxu0 %vm684_vm5, %v2515_v12  ;;  %2273 = vmatpush3.msk.msra.mxu1 %vm786_vm4, %v2515_v12  ;;  %vm681_vm5 = vcmp.eq.s32.totalorder %v680_v36, %v2550_v2  ;;  %vm783_vm4 = vcmp.eq.s32.totalorder %v782_v37, %v2550_v2 }
  0x63   :  { %2255 = vmatprep.subr.mxu0 %v2513_v1  ;;  %2274 = vmatprep.subr.mxu1 %v2513_v1 }
  0x64   :  { %2256 = vmatpush3.msk.msra.mxu0 %vm683_vm11, %v2515_v12  ;;  %2275 = vmatpush3.msk.msra.mxu1 %vm785_vm10, %v2515_v12  ;;  %vm3466_vm11 = vcmp.eq.s32.totalorder %v2705_v26, %v2559_v5  ;;  %vm3467_vm10 = vcmp.eq.s32.totalorder %v2710_v27, %v2559_v5 }
  0x65   :  { %2257 = vmatprep.subr.mxu0 %v2513_v1  ;;  %2276 = vmatprep.subr.mxu1 %v2513_v1 }
  0x66   :  { %2258 = vmatpush3.msk.msra.mxu0 %vm682_vm9, %v2515_v12  ;;  %2277 = vmatpush3.msk.msra.mxu1 %vm784_vm7, %v2515_v12  ;;  %vm3468_vm9 = vcmp.eq.s32.totalorder %v2705_v26, %v2562_v6  ;;  %vm3469_vm7 = vcmp.eq.s32.totalorder %v2710_v27, %v2562_v6 }
  0x67   :  { %2259 = vmatprep.subr.mxu0 %v2513_v1  ;;  %2278 = vmatprep.subr.mxu1 %v2513_v1 }
  0x68   :  { %2260 = vmatpush3.msk.msra.mxu0 %vm681_vm5, %v2515_v12  ;;  %2261 = vmatprep.mubr.msk.f32.mxu0 %vm2514_vm0, %v2513_v1  ;;  %vm3470_vm5 = vcmp.eq.s32.totalorder %v2705_v26, %v2573_v10 }
  0x69   :  { %2279 = vmatpush3.msk.msra.mxu1 %vm783_vm4, %v2515_v12  ;;  %2262 = vmatmul.mubr.msk.f32.vlgmr.msra.gmra.mxu0 %vm90_vm2, %v2644_v22  ;;  %vm3471_vm4 = vcmp.eq.s32.totalorder %v2710_v27, %v2573_v10 }
  0x6a   :  { %2280 = vmatprep.mubr.msk.f32.mxu1 %vm2514_vm0, %v2513_v1  ;;  %2283 = vmatprep.subr.mxu0 %v2513_v1 }
  0x6b   :  { %2302 = vmatprep.subr.mxu1 %v2513_v1  ;;  %2281 = vmatmul.mubr.msk.f32.vlgmr.msra.gmra.mxu1 %vm90_vm2, %v2644_v22 }
  0x6c   :  { %2284 = vmatpush3.msk.msra.mxu0 %vm3466_vm11, %v2515_v12  ;;  %2303 = vmatpush3.msk.msra.mxu1 %vm3467_vm10, %v2515_v12  ;;  %vm3472_vm11 = vcmp.eq.s32.totalorder %v2705_v26, %v2576_v11  ;;  %vm3473_vm10 = vcmp.eq.s32.totalorder %v2710_v27, %v2576_v11 }
  0x6d   :  { %2285 = vmatprep.subr.mxu0 %v2513_v1  ;;  %2304 = vmatprep.subr.mxu1 %v2513_v1 }
  0x6e   :  { %2286 = vmatpush3.msk.msra.mxu0 %vm3468_vm9, %v2515_v12  ;;  %2305 = vmatpush3.msk.msra.mxu1 %vm3469_vm7, %v2515_v12  ;;  %vm3474_vm9 = vcmp.eq.s32.totalorder %v2705_v26, %v2589_v13  ;;  %vm3475_vm7 = vcmp.eq.s32.totalorder %v2710_v27, %v2589_v13 }
  0x6f   :  { %2287 = vmatprep.subr.mxu0 %v2513_v1  ;;  %2306 = vmatprep.subr.mxu1 %v2513_v1 }
  0x70   :  { %2288 = vmatpush3.msk.msra.mxu0 %vm3470_vm5, %v2515_v12  ;;  %2307 = vmatpush3.msk.msra.mxu1 %vm3471_vm4, %v2515_v12  ;;  %vm3476_vm5 = vcmp.eq.s32.totalorder %v2705_v26, %v2598_v14  ;;  %vm3477_vm4 = vcmp.eq.s32.totalorder %v2710_v27, %v2598_v14 }
  0x71   :  { %2289 = vmatprep.subr.mxu0 %v2513_v1  ;;  %2308 = vmatprep.subr.mxu1 %v2513_v1 }
  0x72   :  { %2290 = vmatpush3.msk.msra.mxu0 %vm3472_vm11, %v2515_v12  ;;  %2309 = vmatpush3.msk.msra.mxu1 %vm3473_vm10, %v2515_v12  ;;  %vm3478_vm11 = vcmp.eq.s32.totalorder %v2705_v26, %v2607_v15  ;;  %vm3479_vm10 = vcmp.eq.s32.totalorder %v2710_v27, %v2607_v15 }
  0x73   :  { %2291 = vmatprep.subr.mxu0 %v2513_v1  ;;  %2310 = vmatprep.subr.mxu1 %v2513_v1 }
  0x74   :  { %2292 = vmatpush3.msk.msra.mxu0 %vm3474_vm9, %v2515_v12  ;;  %2311 = vmatpush3.msk.msra.mxu1 %vm3475_vm7, %v2515_v12  ;;  %vm3480_vm9 = vcmp.eq.s32.totalorder %v2705_v26, %v2550_v2  ;;  %vm3481_vm7 = vcmp.eq.s32.totalorder %v2710_v27, %v2550_v2 }
  0x75   :  { %2293 = vmatprep.subr.mxu0 %v2513_v1  ;;  %2312 = vmatprep.subr.mxu1 %v2513_v1 }
  0x76   :  { %2294 = vmatpush3.msk.msra.mxu0 %vm3476_vm5, %v2515_v12  ;;  %2313 = vmatpush3.msk.msra.mxu1 %vm3477_vm4, %v2515_v12  ;;  %vm3482_vm5 = vcmp.eq.s32.totalorder %v2713_v28, %v2559_v5  ;;  %vm3483_vm4 = vcmp.eq.s32.totalorder %v2728_v29, %v2559_v5 }
  0x77   :  { %2295 = vmatprep.subr.mxu0 %v2513_v1  ;;  %2314 = vmatprep.subr.mxu1 %v2513_v1 }
  0x78   :  { %2296 = vmatpush3.msk.msra.mxu0 %vm3478_vm11, %v2515_v12  ;;  %2315 = vmatpush3.msk.msra.mxu1 %vm3479_vm10, %v2515_v12  ;;  %vm3484_vm11 = vcmp.eq.s32.totalorder %v2713_v28, %v2562_v6  ;;  %vm3485_vm10 = vcmp.eq.s32.totalorder %v2728_v29, %v2562_v6 }
  0x79   :  { %2297 = vmatprep.subr.mxu0 %v2513_v1  ;;  %2316 = vmatprep.subr.mxu1 %v2513_v1 }
  0x7a   :  { %2298 = vmatpush3.msk.msra.mxu0 %vm3480_vm9, %v2515_v12  ;;  %2299 = vmatprep.mubr.msk.f32.mxu0 %vm2514_vm0, %v2513_v1  ;;  %vm3486_vm9 = vcmp.eq.s32.totalorder %v2713_v28, %v2573_v10 }
  0x7b   :  { %2317 = vmatpush3.msk.msra.mxu1 %vm3481_vm7, %v2515_v12  ;;  %2300 = vmatmul.mubr.msk.f32.vlgmr.msra.gmra.mxu0 %vm90_vm2, %v2644_v22  ;;  %vm3487_vm7 = vcmp.eq.s32.totalorder %v2728_v29, %v2573_v10 }
  0x7c   :  { %2318 = vmatprep.mubr.msk.f32.mxu1 %vm2514_vm0, %v2513_v1  ;;  %2321 = vmatprep.subr.mxu0 %v2513_v1 }
  0x7d   :  { %2340 = vmatprep.subr.mxu1 %v2513_v1  ;;  %2319 = vmatmul.mubr.msk.f32.vlgmr.msra.gmra.mxu1 %vm90_vm2, %v2644_v22 }
  0x7e   :  { %2322 = vmatpush3.msk.msra.mxu0 %vm3482_vm5, %v2515_v12  ;;  %2341 = vmatpush3.msk.msra.mxu1 %vm3483_vm4, %v2515_v12  ;;  %vm3488_vm5 = vcmp.eq.s32.totalorder %v2713_v28, %v2576_v11  ;;  %vm3489_vm4 = vcmp.eq.s32.totalorder %v2728_v29, %v2576_v11 }
  0x7f   :  { %2323 = vmatprep.subr.mxu0 %v2513_v1  ;;  %2342 = vmatprep.subr.mxu1 %v2513_v1 }
  0x80   :  { %2324 = vmatpush3.msk.msra.mxu0 %vm3484_vm11, %v2515_v12  ;;  %2343 = vmatpush3.msk.msra.mxu1 %vm3485_vm10, %v2515_v12  ;;  %vm3490_vm11 = vcmp.eq.s32.totalorder %v2713_v28, %v2589_v13  ;;  %vm3491_vm10 = vcmp.eq.s32.totalorder %v2728_v29, %v2589_v13 }
  0x81   :  { %2325 = vmatprep.subr.mxu0 %v2513_v1  ;;  %2344 = vmatprep.subr.mxu1 %v2513_v1 }
  0x82   :  { %2326 = vmatpush3.msk.msra.mxu0 %vm3486_vm9, %v2515_v12  ;;  %2345 = vmatpush3.msk.msra.mxu1 %vm3487_vm7, %v2515_v12  ;;  %vm3492_vm9 = vcmp.eq.s32.totalorder %v2713_v28, %v2598_v14  ;;  %vm3493_vm7 = vcmp.eq.s32.totalorder %v2728_v29, %v2598_v14 }
  0x83   :  { %2327 = vmatprep.subr.mxu0 %v2513_v1  ;;  %2346 = vmatprep.subr.mxu1 %v2513_v1 }
  0x84   :  { %2328 = vmatpush3.msk.msra.mxu0 %vm3488_vm5, %v2515_v12  ;;  %2347 = vmatpush3.msk.msra.mxu1 %vm3489_vm4, %v2515_v12  ;;  %vm3494_vm5 = vcmp.eq.s32.totalorder %v2713_v28, %v2607_v15  ;;  %vm3495_vm4 = vcmp.eq.s32.totalorder %v2728_v29, %v2607_v15 }
  0x85   :  { %2329 = vmatprep.subr.mxu0 %v2513_v1  ;;  %2348 = vmatprep.subr.mxu1 %v2513_v1 }
  0x86   :  { %2330 = vmatpush3.msk.msra.mxu0 %vm3490_vm11, %v2515_v12  ;;  %2349 = vmatpush3.msk.msra.mxu1 %vm3491_vm10, %v2515_v12  ;;  %vm3496_vm11 = vcmp.eq.s32.totalorder %v2713_v28, %v2550_v2  ;;  %vm3497_vm10 = vcmp.eq.s32.totalorder %v2728_v29, %v2550_v2 }
  0x87   :  { %2331 = vmatprep.subr.mxu0 %v2513_v1  ;;  %2350 = vmatprep.subr.mxu1 %v2513_v1 }
  0x88   :  { %2332 = vmatpush3.msk.msra.mxu0 %vm3492_vm9, %v2515_v12  ;;  %2351 = vmatpush3.msk.msra.mxu1 %vm3493_vm7, %v2515_v12  ;;  %vm3498_vm9 = vcmp.eq.s32.totalorder %v2731_v30, %v2559_v5  ;;  %vm3499_vm7 = vcmp.eq.s32.totalorder %v2734_v31, %v2559_v5 }
  0x89   :  { %2333 = vmatprep.subr.mxu0 %v2513_v1  ;;  %2352 = vmatprep.subr.mxu1 %v2513_v1 }
  0x8a   :  { %2334 = vmatpush3.msk.msra.mxu0 %vm3494_vm5, %v2515_v12  ;;  %2353 = vmatpush3.msk.msra.mxu1 %vm3495_vm4, %v2515_v12  ;;  %vm3500_vm5 = vcmp.eq.s32.totalorder %v2731_v30, %v2573_v10  ;;  %vm3501_vm4 = vcmp.eq.s32.totalorder %v2734_v31, %v2573_v10 }
  0x8b   :  { %2335 = vmatprep.subr.mxu0 %v2513_v1  ;;  %2354 = vmatprep.subr.mxu1 %v2513_v1 }
  0x8c   :  { %2336 = vmatpush3.msk.msra.mxu0 %vm3496_vm11, %v2515_v12  ;;  %2337 = vmatprep.mubr.msk.f32.mxu0 %vm2514_vm0, %v2513_v1  ;;  %vm3504_vm11 = vcmp.eq.s32.totalorder %v2734_v31, %v2589_v13 }
  0x8d   :  { %2355 = vmatpush3.msk.msra.mxu1 %vm3497_vm10, %v2515_v12  ;;  %2338 = vmatmul.mubr.msk.f32.vlgmr.msra.gmra.mxu0 %vm90_vm2, %v2644_v22  ;;  %vm3505_vm10 = vcmp.eq.s32.totalorder %v2731_v30, %v2598_v14 }
  0x8e   :  { %2356 = vmatprep.mubr.msk.f32.mxu1 %vm2514_vm0, %v2513_v1  ;;  %2359 = vmatprep.subr.mxu0 %v2513_v1 }
  0x8f   :  { %2378 = vmatprep.subr.mxu1 %v2513_v1  ;;  %2357 = vmatmul.mubr.msk.f32.vlgmr.msra.gmra.mxu1 %vm90_vm2, %v2644_v22 }
  0x90   :  { %2360 = vmatpush3.msk.msra.mxu0 %vm3498_vm9, %v2515_v12  ;;  %2379 = vmatpush3.msk.msra.mxu1 %vm3499_vm7, %v2515_v12  ;;  %vm3506_vm9 = vcmp.eq.s32.totalorder %v2734_v31, %v2598_v14  ;;  %vm3508_vm7 = vcmp.eq.s32.totalorder %v2734_v31, %v2607_v15 }
  0x91   :  { %2361 = vmatprep.subr.mxu0 %v2513_v1  ;;  %2380 = vmatprep.subr.mxu1 %v2513_v1 }
  0x92   :  { %2362 = vmatpush3.msk.msra.mxu0 %vm1298_vm8, %v2515_v12  ;;  %2381 = vmatpush3.msk.msra.mxu1 %vm1400_vm1, %v2515_v12  ;;  %vm3502_vm8 = vcmp.eq.s32.totalorder %v2731_v30, %v2576_v11  ;;  %vm3503_vm1 = vcmp.eq.s32.totalorder %v2734_v31, %v2576_v11 }
  0x93   :  { %2363 = vmatprep.subr.mxu0 %v2513_v1  ;;  %2382 = vmatprep.subr.mxu1 %v2513_v1 }
  0x94   :  { %2364 = vmatpush3.msk.msra.mxu0 %vm3500_vm5, %v2515_v12  ;;  %2383 = vmatpush3.msk.msra.mxu1 %vm3501_vm4, %v2515_v12  ;;  %vm3509_vm5 = vcmp.eq.s32.totalorder %v2731_v30, %v2550_v2  ;;  %vm3510_vm4 = vcmp.eq.s32.totalorder %v2734_v31, %v2550_v2 }
  0x95   :  { %2365 = vmatprep.subr.mxu0 %v2513_v1  ;;  %2384 = vmatprep.subr.mxu1 %v2513_v1 }
  0x96   :  { %2366 = vmatpush3.msk.msra.mxu0 %vm3502_vm8, %v2515_v12  ;;  %2385 = vmatpush3.msk.msra.mxu1 %vm3503_vm1, %v2515_v12  ;;  %vm3511_vm8 = vcmp.eq.s32.totalorder %v2937_v34, %v2559_v5  ;;  %vm3512_vm1 = vcmp.eq.s32.totalorder %v2940_v35, %v2559_v5 }
  0x97   :  { %2367 = vmatprep.subr.mxu0 %v2513_v1  ;;  %2386 = vmatprep.subr.mxu1 %v2513_v1 }
  0x98   :  { %2368 = vmatpush3.msk.msra.mxu0 %vm1295_vm6, %v2515_v12  ;;  %2387 = vmatpush3.msk.msra.mxu1 %vm3504_vm11, %v2515_v12  ;;  %vm3507_vm6 = vcmp.eq.s32.totalorder %v2731_v30, %v2607_v15  ;;  %vm3513_vm11 = vcmp.eq.s32.totalorder %v2937_v34, %v2562_v6  ;;  %v775_v15 = vrot.slane %v60_v38, 6 }
  0x99   :  { %2369 = vmatprep.subr.mxu0 %v2513_v1  ;;  %2388 = vmatprep.subr.mxu1 %v2513_v1 }
  0x9a   :  { %2370 = vmatpush3.msk.msra.mxu0 %vm3505_vm10, %v2515_v12  ;;  %2389 = vmatpush3.msk.msra.mxu1 %vm3506_vm9, %v2515_v12  ;;  %vm3514_vm10 = vcmp.eq.s32.totalorder %v2937_v34, %v2573_v10  ;;  %vm3515_vm9 = vcmp.eq.s32.totalorder %v2940_v35, %v2573_v10 }
  0x9b   :  { %2371 = vmatprep.subr.mxu0 %v2513_v1  ;;  %2390 = vmatprep.subr.mxu1 %v2513_v1 }
  0x9c   :  { %2372 = vmatpush3.msk.msra.mxu0 %vm3507_vm6, %v2515_v12  ;;  %2391 = vmatpush3.msk.msra.mxu1 %vm3508_vm7, %v2515_v12  ;;  %vm3517_vm6 = vcmp.eq.s32.totalorder %v2940_v35, %v2576_v11  ;;  %vm3518_vm7 = vcmp.eq.s32.totalorder %v2937_v34, %v2589_v13 }
  0x9d   :  { %2373 = vmatprep.subr.mxu0 %v2513_v1  ;;  %2392 = vmatprep.subr.mxu1 %v2513_v1 }
  0x9e   :  { %2374 = vmatpush3.msk.msra.mxu0 %vm3509_vm5, %v2515_v12  ;;  %2375 = vmatprep.mubr.msk.f32.mxu0 %vm2514_vm0, %v2513_v1  ;;  %vm3519_vm5 = vcmp.eq.s32.totalorder %v2940_v35, %v2598_v14 }
  0x9f   :  { %2393 = vmatpush3.msk.msra.mxu1 %vm3510_vm4, %v2515_v12  ;;  %2376 = vmatmul.mubr.msk.f32.vlgmr.msra.gmra.mxu0 %vm90_vm2, %v2644_v22 }
  0xa0   :  { %2394 = vmatprep.mubr.msk.f32.mxu1 %vm2514_vm0, %v2513_v1  ;;  %2397 = vmatprep.subr.mxu0 %v2513_v1 }
  0xa1   :  { %2416 = vmatprep.subr.mxu1 %v2513_v1  ;;  %2395 = vmatmul.mubr.msk.f32.vlgmr.msra.gmra.mxu1 %vm90_vm2, %v2644_v22 }
  0xa2   :  { %2398 = vmatpush3.msk.msra.mxu0 %vm3511_vm8, %v2515_v12  ;;  %2417 = vmatpush3.msk.msra.mxu1 %vm3512_vm1, %v2515_v12 }
  0xa3   :  { %2399 = vmatprep.subr.mxu0 %v2513_v1  ;;  %2418 = vmatprep.subr.mxu1 %v2513_v1 }
  0xa4   :  { %2400 = vmatpush3.msk.msra.mxu0 %vm3513_vm11, %v2515_v12  ;;  %2419 = vmatpush3.msk.msra.mxu1 %vm1604_vm14, %v2515_v12  ;;  %vm3516_vm14 = vcmp.eq.s32.totalorder %v2937_v34, %v2576_v11 }
  0xa5   :  { %2401 = vmatprep.subr.mxu0 %v2513_v1  ;;  %2420 = vmatprep.subr.mxu1 %v2513_v1 }
  0xa6   :  { %2402 = vmatpush3.msk.msra.mxu0 %vm3514_vm10, %v2515_v12  ;;  %2421 = vmatpush3.msk.msra.mxu1 %vm3515_vm9, %v2515_v12 }
  0xa7   :  { %2403 = vmatprep.subr.mxu0 %v2513_v1  ;;  %2422 = vmatprep.subr.mxu1 %v2513_v1 }
  0xa8   :  { %2404 = vmatpush3.msk.msra.mxu0 %vm3516_vm14, %v2515_v12  ;;  %2423 = vmatpush3.msk.msra.mxu1 %vm3517_vm6, %v2515_v12 }
  0xa9   :  { %2405 = vmatprep.subr.mxu0 %v2513_v1  ;;  %2424 = vmatprep.subr.mxu1 %v2513_v1 }
  0xaa   :  { %2406 = vmatpush3.msk.msra.mxu0 %vm3518_vm7, %v2515_v12  ;;  %2425 = vmatpush3.msk.msra.mxu1 %vm1601_vm13, %v2515_v12  ;;  %vm3520_vm13 = vcmp.eq.s32.totalorder %v2937_v34, %v2550_v2  ;;  %v1386_v34 = vrot.slane %v61_v18, 4 }
  0xab   :  { %2407 = vmatprep.subr.mxu0 %v2513_v1  ;;  %2426 = vmatprep.subr.mxu1 %v2513_v1 }
  0xac   :  { %2408 = vmatpush3.msk.msra.mxu0 %vm1498_vm15, %v2515_v12  ;;  %2427 = vmatpush3.msk.msra.mxu1 %vm3519_vm5, %v2515_v12  ;;  %vm3521_vm15 = vcmp.eq.s32.totalorder %v2940_v35, %v2550_v2 }
  0xad   :  { %2409 = vmatprep.subr.mxu0 %v2513_v1  ;;  %2428 = vmatprep.subr.mxu1 %v2513_v1 }
  0xae   :  { %2410 = vmatpush3.msk.msra.mxu0 %vm1497_vm3, %v2515_v12  ;;  %2429 = vmatpush3.msk.msra.mxu1 %vm1599_vm12, %v2515_v12 }
  0xaf   :  { %2411 = vmatprep.subr.mxu0 %v2513_v1  ;;  %2430 = vmatprep.subr.mxu1 %v2513_v1 }
  0xb0   :  { %2412 = vmatpush3.msk.msra.mxu0 %vm3520_vm13, %v2515_v12  ;;  %2413 = vmatprep.mubr.msk.f32.mxu0 %vm2514_vm0, %v2513_v1 }
  0xb1   :  { %2431 = vmatpush3.msk.msra.mxu1 %vm3521_vm15, %v2515_v12  ;;  %2432 = vmatprep.mubr.msk.f32.mxu1 %vm2514_vm0, %v2513_v1 }
  0xb2   :  { %2414 = vmatmul.mubr.msk.f32.vlgmr.msra.gmra.mxu0 %vm90_vm2, %v2644_v22  ;;  %2433 = vmatmul.mubr.msk.f32.vlgmr.msra.gmra.mxu1 %vm90_vm2, %v2644_v22  ;;  %v1080_v22 = vrot.slane %v61_v18, 1 }
  0xf4   :  { %v160_v40 = vpop.f32.mrf.mxu0 }
  0xf5   :  { %v164_v41 = vmul.f32 %v160_v40, %v60_v38  ;;  %v260_v42 = vpop.f32.mrf.mxu1  ;;  %v1488_v38 = vrot.slane %v61_v18, 5 }
  0xf6   :  { %v267_v43 = vmul.f32 %v265_v39, %v260_v42  ;;  %v2149_v44 = vpop.f32.mrf.mxu0  ;;  %v1590_v42 = vrot.slane %v61_v18, 6 }
  0xf7   :  { %v2168_v45 = vpop.f32.mrf.mxu1 }
  0xf8   :  { %v268_v46 = vadd.f32 %v267_v43, %v164_v41  ;;  %v1692_v43 = vrot.slane %v61_v18, 7 }
 0x105   :  { %v363_v49 = vpop.f32.mrf.mxu0 }
 0x106   :  { %v369_v50 = vmul.f32 %v367_v47, %v363_v49 }
 0x107   :  { %v465_v51 = vpop.f32.mrf.mxu1  ;;  %v2187_v52 = vpop.f32.mrf.mxu0 }
 0x108   :  { %v370_v53 = vadd.f32 %v369_v50, %v268_v46  ;;  %v471_v54 = vmul.f32 %v469_v48, %v465_v51  ;;  %v1696_v52 = vstv %s3463_s3 }
 0x109   :  { %v2206_v55 = vpop.f32.mrf.mxu1 }
 0x10a   :  { %v472_v56 = vadd.f32 %v471_v54, %v370_v53 }
 0x117   :  { %v567_v59 = vpop.f32.mrf.mxu0 }
 0x118   :  { %v573_v60 = vmul.f32 %v571_v57, %v567_v59 }
 0x119   :  { %v669_v61 = vpop.f32.mrf.mxu1  ;;  %v2225_v62 = vpop.f32.mrf.mxu0 }
 0x11a   :  { %v574_v63 = vadd.f32 %v573_v60, %v472_v56  ;;  %v675_v0 = vmul.f32 %v673_v58, %v669_v61 }
 0x11b   :  { %v2244_v1 = vpop.f32.mrf.mxu1 }
 0x11c   :  { %v676_v2 = vadd.f32 %v675_v0, %v574_v63 }
 0x129   :  { %v771_v3 = vpop.f32.mrf.mxu0 }
 0x12a   :  { %v777_v16 = vmul.f32 %v775_v15, %v771_v3 }
 0x12b   :  { %v873_v4 = vpop.f32.mrf.mxu1  ;;  %v2263_v5 = vpop.f32.mrf.mxu0 }
 0x12c   :  { %v778_v19 = vadd.f32 %v777_v16, %v676_v2  ;;  %v879_v20 = vmul.f32 %v877_v17, %v873_v4 }
 0x12d   :  { %v2282_v6 = vpop.f32.mrf.mxu1 }
 0x12e   :  { %v880_v24 = vadd.f32 %v879_v20, %v778_v19 }
 0x13b   :  { %v975_v7 = vpop.f32.mrf.mxu0 }
 0x13c   :  { %v979_v21 = vmul.f32 %v975_v7, %v61_v18 }
 0x13d   :  { %v1075_v8 = vpop.f32.mrf.mxu1  ;;  %v2301_v9 = vpop.f32.mrf.mxu0 }
 0x13e   :  { %v980_v28 = vadd.f32 %v979_v21, %v880_v24  ;;  %v1082_v29 = vmul.f32 %v1080_v22, %v1075_v8 }
 0x13f   :  { %v2320_v10 = vpop.f32.mrf.mxu1 }
 0x140   :  { %v1083_v33 = vadd.f32 %v1082_v29, %v980_v28 }
 0x14d   :  { %v1178_v11 = vpop.f32.mrf.mxu0 }
 0x14e   :  { %v1184_v31 = vmul.f32 %v1182_v25, %v1178_v11 }
 0x14f   :  { %v1280_v12 = vpop.f32.mrf.mxu1  ;;  %v2339_v13 = vpop.f32.mrf.mxu0 }
 0x150   :  { %v1185_v35 = vadd.f32 %v1184_v31, %v1083_v33  ;;  %v1286_v36 = vmul.f32 %v1284_v32, %v1280_v12 }
 0x151   :  { %v2358_v14 = vpop.f32.mrf.mxu1 }
 0x152   :  { %v1287_v39 = vadd.f32 %v1286_v36, %v1185_v35 }
 0x15f   :  { %v1382_v23 = vpop.f32.mrf.mxu0 }
 0x160   :  { %v1388_v37 = vmul.f32 %v1386_v34, %v1382_v23 }
 0x161   :  { %v1484_v26 = vpop.f32.mrf.mxu1  ;;  %v2377_v27 = vpop.f32.mrf.mxu0 }
 0x162   :  { %v1389_v40 = vadd.f32 %v1388_v37, %v1287_v39  ;;  %v1490_v41 = vmul.f32 %v1488_v38, %v1484_v26 }
 0x163   :  { %v2396_v30 = vpop.f32.mrf.mxu1 }
 0x164   :  { %v1491_v46 = vadd.f32 %v1490_v41, %v1389_v40 }
 0x172   :  { %v1586_v44 = vpop.f32.mrf.mxu0  ;;  %v1688_v45 = vpop.f32.mrf.mxu1 }
 0x173   :  { %v1592_v47 = vmul.f32 %v1590_v42, %v1586_v44  ;;  %v1694_v48 = vmul.f32 %v1692_v43, %v1688_v45 }
 0x174   :  { %v2415_v49 = vpop.f32.mrf.mxu0  ;;  %v2434_v50 = vpop.f32.mrf.mxu1 }
 0x175   :  { %v1593_v51 = vadd.f32 %v1592_v47, %v1491_v46 }
 0x177   :  { %v1695_v53 = vadd.f32 %v1694_v48, %v1593_v51 }
 0x179   :  { %v1697_v54 = vadd.f32 %v1696_v52, %v1695_v53 }
 0x17b   :  { %1698 = vst [vmem:[#allocation8] sm:$0x1] %v1697_v54 }
 0x17c   :  { %2494 = shalt.err (!%p2491_p0)
}
 0x17d   :  { %1708 = dma.vmem_to_hbm [thread:$0]  %s1706_s29, 16, %s3464_s4, [#allocation5]  }
 0x17e   :  { %2507 = dma.done.wait [#allocation5], 16  }
 0x17f   :  { %2508 = vsyncadd [#allocation5], 4294967280 }
 0x180   :  { %1712 = vsyncpa [#allocation4], 1 }
 0x181   :  { %1713 = vsyncpa [#allocation7], 1 }
 0x182   :  { %1714 = vsyncpa [#allocation5], 1 }

</bundles_post_ra>
